<compile_context>
chip_gen: v7x
topology: tpu7x:2x2x1
jax: 0.10.0
libtpu: 0.0.40
codegen_flags: <defaults>
</compile_context>

<pallas_src>
import functools
import math

import jax
import jax.numpy as jnp
from jax.experimental import pallas as pl
from jax.experimental.pallas import tpu as pltpu

_MM_DTYPE = jnp.bfloat16        # MXU input dtype (accumulation stays f32)
_MASK_VAL = -1e30               # only used by the pure-JAX reference


# ------------------------------ helpers --------------------------------------

def _round_up(x, m):
    return ((x + m - 1) // m) * m


def _choose_tiles(n, block_q, block_k):
    """Pick dst/src tiles and the padded node count (no full-N fallback)."""
    # dst tile: multiple of 32 (int8 sublane packing), never larger than padded n
    tq = max(32, min(_round_up(block_q, 32), _round_up(n, 32)))
    # v7x megacore: prefer >= 4 dst tiles when the graph is large enough
    while tq > 128 and (_round_up(n, tq) // tq) < 4:
        tq //= 2
    tq = max(32, _round_up(tq, 32))
    # src tile: lane-aligned multiple of 128
    ts = max(128, min(_round_up(block_k, 128), _round_up(n, 128)))
    lcm = tq * ts // math.gcd(tq, ts)
    npad = _round_up(n, lcm)
    return tq, ts, npad


def _vmem_bytes(blocks):
    """Scoped-VMEM request from block shapes (double buffered), capped below 48 MiB."""
    total = 0
    for (r, c, itemsize) in blocks:
        total += int(r) * int(c) * int(itemsize)
    return int(min(max(2 * total + (4 << 20), 16 << 20), 48 << 20))


# ----------------------------- Pallas kernels --------------------------------

def _project_kernel(x_ref, w_ref, *out_refs, hf_pad, num_heads, has_res):
    """One bf16 MXU pass: y = x @ [Wf_pad | Rwf_pad | W@a] -> feat (bf16), res, scores."""
    y = jnp.dot(x_ref[...].astype(_MM_DTYPE), w_ref[...].astype(_MM_DTYPE),
                preferred_element_type=jnp.float32)
    feat_ref = out_refs[0]
    feat_ref[...] = y[:, :hf_pad].astype(feat_ref.dtype)          # bf16 feat (lane dense)
    if has_res:
        res_ref, sc_ref = out_refs[1], out_refs[2]
        res_ref[...] = y[:, hf_pad:2 * hf_pad]                    # projection residual
        sc_ref[...] = y[:, 2 * hf_pad:2 * hf_pad + 2 * num_heads]
    else:
        sc_ref = out_refs[1]
        sc_ref[...] = y[:, hf_pad:hf_pad + 2 * num_heads]         # [el_0..el_H-1 | er_...]


def _attn_agg_kernel(mask_ref, er_ref, elt_ref, feat_ref, expand_ref, *rest,
                     num_heads, out_feats, neg_slope, use_act, has_res):
    """Tiled masked edge-softmax + aggregation for all heads (flash-style online softmax).

    grid = (dst tiles [parallel], src tiles [arbitrary]).  Per-head softmax state
    (m, l) and the fused-head aggregation accumulator live in VMEM scratch; the residual,
    ELU and the lane-dense (tq, HFpad) store happen on the last src tile.
    """
    if has_res:
        res_ref, out_ref, m_scr, l_scr, acc_scr = rest
    else:
        res_ref = None
        out_ref, m_scr, l_scr, acc_scr = rest

    H, F = num_heads, out_feats
    j = pl.program_id(1)

    @pl.when(j == 0)
    def _init():
        m_scr[...] = jnp.full(m_scr.shape, -jnp.inf, m_scr.dtype)
        l_scr[...] = jnp.zeros(l_scr.shape, l_scr.dtype)
        acc_scr[...] = jnp.zeros(acc_scr.shape, acc_scr.dtype)

    maskf = mask_ref[...].astype(jnp.float32)       # (tq, ts) 0/1 adjacency (int8 in HBM)
    er = er_ref[...]                                # (tq, H)  er of dst rows
    elt = elt_ref[...]                              # (H, ts)  el of src rows (row layout)
    feat = feat_ref[...]                            # (ts, HFpad) projected src feats, bf16

    for h in range(H):                              # H is small & static -> unrolled
        # e[dst, src] = LeakyReLU(er[dst] + el[src])
        e = er[:, h:h + 1] + elt[h:h + 1, :]                        # (tq, ts)
        e = jnp.maximum(e, neg_slope * e)
        m_old = m_scr[:, h:h + 1]
        m_new = jnp.maximum(m_old, jnp.max(e, axis=-1, keepdims=True))
        p = jnp.exp(e - m_new) * maskf              # multiplicative mask: non-edges exactly 0
        scale = jnp.exp(m_old - m_new)
        l_scr[:, h:h + 1] = scale * l_scr[:, h:h + 1] + jnp.sum(p, axis=-1, keepdims=True)
        acc_scr[:, h * F:(h + 1) * F] = (
            scale * acc_scr[:, h * F:(h + 1) * F]
            + jnp.dot(p.astype(_MM_DTYPE), feat[:, h * F:(h + 1) * F],
                      preferred_element_type=jnp.float32))
        m_scr[:, h:h + 1] = m_new

    @pl.when(j == pl.num_programs(1) - 1)
    def _finalize():
        inv = pl.reciprocal(l_scr[...], approx=True)        # (tq, H) on the EUP slot
        expand = expand_ref[...]                            # (H, HFpad) 0/1 head expander
        inv_full = inv[:, 0:1] * expand[0:1, :]             # lane-dense per-column 1/l
        for h in range(1, H):
            inv_full = inv_full + inv[:, h:h + 1] * expand[h:h + 1, :]
        rst = acc_scr[...] * inv_full                       # (tq, HFpad), padding cols stay 0
        if has_res:
            rst = rst + res_ref[...]
        if use_act:                                         # ELU(alpha=1)
            rst = jnp.where(rst > 0, rst, jnp.exp(rst) - 1.0)
        out_ref[...] = rst.astype(out_ref.dtype)            # single lane-dense store


# ------------------------------ layer wrapper ---------------------------------

def gat_conv(maskp, x, p, negative_slope, *, tq, ts):
    """One GATConv layer (all heads fused).  x is (Npad, Fin_pad); returns (Npad, HFpad)."""
    npad, fin_pad = x.shape
    H, F = p["num_heads"], p["out_feats"]
    hf_pad = p["hf_pad"]
    res_mode = p["res_mode"]
    wfull, expand = p["wfull"], p["expand"]
    wtot = wfull.shape[1]
    has_res_out = (res_mode == "proj")

    # ---- kernel A: fused projection + folded attention scores (+ proj residual) ----
    out_shape = [jax.ShapeDtypeStruct((npad, hf_pad), jnp.bfloat16)]
    out_specs = [pl.BlockSpec((tq, hf_pad), lambda i: (i, 0))]
    if has_res_out:
        out_shape.append(jax.ShapeDtypeStruct((npad, hf_pad), jnp.float32))
        out_specs.append(pl.BlockSpec((tq, hf_pad), lambda i: (i, 0)))
    out_shape.append(jax.ShapeDtypeStruct((npad, 2 * H), jnp.float32))
    out_specs.append(pl.BlockSpec((tq, 2 * H), lambda i: (i, 0)))

    blocks_a = [(tq, fin_pad, 4), (fin_pad, wtot, 4), (tq, hf_pad, 2), (tq, 2 * H, 4)]
    if has_res_out:
        blocks_a.append((tq, hf_pad, 4))

    outs = pl.pallas_call(
        functools.partial(_project_kernel, hf_pad=hf_pad, num_heads=H, has_res=has_res_out),
        grid=(npad // tq,),
        in_specs=[pl.BlockSpec((tq, fin_pad), lambda i: (i, 0)),
                  pl.BlockSpec((fin_pad, wtot), lambda i: (0, 0))],
        out_specs=tuple(out_specs),
        out_shape=tuple(out_shape),
        compiler_params=pltpu.CompilerParams(
            dimension_semantics=("parallel",),
            vmem_limit_bytes=_vmem_bytes(blocks_a)),
    )(x, wfull)

    if has_res_out:
        feat, res, scores = outs
    else:
        feat, scores = outs
        res = x if res_mode == "identity" else None     # identity residual: plain padded x

    el_t = jnp.transpose(scores[:, :H])   # (H, Npad): row layout for src rows (done once)
    er = scores[:, H:]                    # (Npad, H): dst rows only (skip unused el half)

    # ---- kernel B: tiled masked softmax + aggregation (+ residual, ELU) ----
    in_specs = [
        pl.BlockSpec((tq, ts), lambda i, j: (i, j)),       # int8 adjacency mask
        pl.BlockSpec((tq, H), lambda i, j: (i, 0)),        # er of dst rows
        pl.BlockSpec((H, ts), lambda i, j: (0, j)),        # el of src rows (row layout)
        pl.BlockSpec((ts, hf_pad), lambda i, j: (j, 0)),   # projected src feats (bf16)
        pl.BlockSpec((H, hf_pad), lambda i, j: (0, 0)),    # head-expander constant
    ]
    args = [maskp, er, el_t, feat, expand]
    blocks_b = [(tq, ts, 1), (tq, H, 4), (H, ts, 4), (ts, hf_pad, 2), (H, hf_pad, 4),
                (tq, hf_pad, 4), (tq, H, 4), (tq, H, 4), (tq, hf_pad, 4)]
    if res is not None:
        in_specs.append(pl.BlockSpec((tq, hf_pad), lambda i, j: (i, 0)))
        args.append(res)
        blocks_b.append((tq, hf_pad, 4))

    out = pl.pallas_call(
        functools.partial(_attn_agg_kernel, num_heads=H, out_feats=F,
                          neg_slope=negative_slope, use_act=p["activation"],
                          has_res=res is not None),
        grid=(npad // tq, npad // ts),
        in_specs=in_specs,
        out_specs=pl.BlockSpec((tq, hf_pad), lambda i, j: (i, 0)),
        out_shape=jax.ShapeDtypeStruct((npad, hf_pad), jnp.float32),
        scratch_shapes=[pltpu.VMEM((tq, H), jnp.float32),      # running max (per head)
                        pltpu.VMEM((tq, H), jnp.float32),      # running sum (per head)
                        pltpu.VMEM((tq, hf_pad), jnp.float32)],  # fused-head accumulator
        compiler_params=pltpu.CompilerParams(
            dimension_semantics=("parallel", "arbitrary"),
            vmem_limit_bytes=_vmem_bytes(blocks_b)),
    )(*args)
    return out


# ------------------------------ model glue ------------------------------------

def init_gat_params(key, num_layers, in_dim, num_hidden, num_classes, heads, residual):
    """Deterministic synthetic parameters matching DGL GATConv shapes, plus fused/padded copies."""
    cfg = []
    fin = in_dim
    for l in range(num_layers):
        cfg.append((fin, num_hidden, heads[l], (l > 0) and residual, True))
        fin = num_hidden * heads[l]
    cfg.append((fin, num_classes, heads[-1], residual, False))

    params = []
    for (fi, fo, h, use_res, act) in cfg:
        key, k1, k2, k3, k4 = jax.random.split(key, 5)
        gain = jnp.sqrt(2.0)
        w = gain * jax.random.normal(k1, (h, fi, fo), jnp.float32) / jnp.sqrt(fi)
        al = gain * jax.random.normal(k2, (h, fo), jnp.float32) / jnp.sqrt(fo)
        ar = gain * jax.random.normal(k3, (h, fo), jnp.float32) / jnp.sqrt(fo)

        if not use_res:
            res_mode, rw = "none", None
        elif fi == h * fo:
            res_mode, rw = "identity", None          # DGL Identity residual
        else:
            res_mode = "proj"
            rw = jax.random.normal(k4, (h, fi, fo), jnp.float32) / jnp.sqrt(fi)

        fin_pad = _round_up(fi, 128)
        hf = h * fo
        hf_pad = _round_up(hf, 128)

        # fused, lane-padded projection weight (Fin_pad, HFpad)
        wf = jnp.zeros((fin_pad, hf_pad), jnp.float32)
        for i in range(h):
            wf = wf.at[:fi, i * fo:(i + 1) * fo].set(w[i])
        # folded attention-score weights: x @ waw = [el_0..el_H-1 | er_0..er_H-1]
        waw = jnp.zeros((fin_pad, 2 * h), jnp.float32)
        for i in range(h):
            waw = waw.at[:fi, i].set(w[i] @ al[i])
            waw = waw.at[:fi, h + i].set(w[i] @ ar[i])
        pieces = [wf]
        if res_mode == "proj":
            rwf = jnp.zeros((fin_pad, hf_pad), jnp.float32)
            for i in range(h):
                rwf = rwf.at[:fi, i * fo:(i + 1) * fo].set(rw[i])
            pieces.append(rwf)
        pieces.append(waw)
        wfull = jnp.concatenate(pieces, axis=1)       # (Fin_pad, HFpad [+HFpad] + 2H)

        # head-expander used for the lane-dense epilogue normalization
        expand = jnp.zeros((h, hf_pad), jnp.float32)
        for i in range(h):
            expand = expand.at[i, i * fo:(i + 1) * fo].set(1.0)

        params.append(dict(w=w, al=al, ar=ar, rw=rw, res_mode=res_mode,
                           wfull=wfull, expand=expand,
                           fin_pad=fin_pad, hf=hf, hf_pad=hf_pad,
                           num_heads=h, out_feats=fo, activation=act))
    return params


def gat_forward(adj, x, params, negative_slope, *, block_q=256, block_k=512):
    n = x.shape[0]
    tq, ts, npad = _choose_tiles(n, block_q, block_k)

    # int8 0/1 adjacency mask padded to the tiled node count; padded nodes get a self loop
    # (their features are zero, so their outputs stay exactly zero - no NaN propagation).
    mask = (adj > 0).astype(jnp.int8)
    maskp = jnp.zeros((npad, npad), jnp.int8).at[:n, :n].set(mask)
    if npad > n:
        idx = jnp.arange(n, npad)
        maskp = maskp.at[idx, idx].set(jnp.int8(1))

    # activations stay lane-padded (padding columns are exactly 0) between layers
    h = jnp.zeros((npad, params[0]["fin_pad"]), jnp.float32).at[:n, :x.shape[1]].set(x)
    for p in params:
        h = gat_conv(maskp, h, p, negative_slope, tq=tq, ts=ts)   # (Npad, HFpad) == flatten(1)

    p = params[-1]
    H, F = p["num_heads"], p["out_feats"]
    out = h[:n, :H * F].reshape(n, H, F)
    return out.mean(axis=1)                                       # final .mean(1)


# ----------------- pure-JAX reference (same math, no Pallas) -------------------

def _gat_conv_ref(adj, x, w, al, ar, res_mode, rw, negative_slope, activation):
    H, _, Fout = w.shape
    outs = []
    for hd in range(H):
        feat = jnp.dot(x.astype(_MM_DTYPE), w[hd].astype(_MM_DTYPE),
                       preferred_element_type=jnp.float32)
        el = jnp.sum(feat * al[hd], -1, keepdims=True)
        er = jnp.sum(feat * ar[hd], -1, keepdims=True)
        e = er + el.T
        e = jnp.where(e > 0, e, negative_slope * e)
        e = jnp.where(adj > 0, e, _MASK_VAL)
        e = e - e.max(-1, keepdims=True)
        p = jnp.where(adj > 0, jnp.exp(e), 0.0)
        alpha = p / p.sum(-1, keepdims=True)
        r = jnp.dot(alpha.astype(_MM_DTYPE), feat.astype(_MM_DTYPE),
                    preferred_element_type=jnp.float32)
        if res_mode == "identity":
            r = r + x[:, hd * Fout:(hd + 1) * Fout]
        elif res_mode == "proj":
            r = r + jnp.dot(x.astype(_MM_DTYPE), rw[hd].astype(_MM_DTYPE),
                            preferred_element_type=jnp.float32)
        if activation:
            r = jnp.where(r > 0, r, jnp.exp(r) - 1.0)
        outs.append(r)
    return jnp.concatenate(outs, axis=-1)          # (N, H*Fout)


def gat_forward_ref(adj, x, params, negative_slope):
    h = x
    for p in params[:-1]:
        h = _gat_conv_ref(adj, h, p["w"], p["al"], p["ar"], p["res_mode"], p["rw"],
                          negative_slope, p["activation"])
    p = params[-1]
    out = _gat_conv_ref(adj, h, p["w"], p["al"], p["ar"], p["res_mode"], p["rw"],
                        negative_slope, p["activation"])
    N = out.shape[0]
    return out.reshape(N, p["num_heads"], p["out_feats"]).mean(axis=1)


# --------------------------------- main ----------------------------------------

def _run_case(key, *, N, in_dim, num_hidden, num_classes, num_layers, heads,
              negative_slope, residual, block_q, block_k, tol):
    k_adj, k_x, k_p = jax.random.split(key, 3)
    adj = (jax.random.uniform(k_adj, (N, N)) < 0.25).astype(jnp.float32)
    adj = jnp.maximum(adj, jnp.eye(N, dtype=jnp.float32))            # self loops
    x = jax.random.normal(k_x, (N, in_dim), jnp.float32)

    params = init_gat_params(k_p, num_layers, in_dim, num_hidden,
                             num_classes, heads, residual)

    logits = gat_forward(adj, x, params, negative_slope,
                         block_q=block_q, block_k=block_k)
    logits = jax.block_until_ready(logits)

    ref = gat_forward_ref(adj, x, params, negative_slope)
    assert logits.shape == (N, num_classes), logits.shape
    err = float(jnp.max(jnp.abs(logits - ref)))
    assert jnp.allclose(logits, ref, atol=tol, rtol=tol), err
    return logits


if __name__ == "__main__":
    key = jax.random.PRNGKey(0)
    k1, k2 = jax.random.split(key)

    # small case from the module spec (N pads to one 128-wide src tile, 4 dst tiles)
    _run_case(k1, N=32, in_dim=16, num_hidden=8, num_classes=4, num_layers=2,
              heads=[2, 2, 1], negative_slope=0.2, residual=True,
              block_q=128, block_k=128, tol=5e-2)

    # larger, non-divisible N: exercises N-padding + multi-src-tile online softmax (3x3 grid)
    _run_case(k2, N=300, in_dim=64, num_hidden=32, num_classes=8, num_layers=2,
              heads=[2, 2, 1], negative_slope=0.2, residual=True,
              block_q=128, block_k=128, tol=5e-2)

    print("KERNEL_OK")
</pallas_src>

<mosaic_0001>
module attributes {stable_mosaic.version = 11 : i64} {
  func.func @_project_kernel(%arg0: i32, %arg1: memref<32x128xf32, #tpu.memory_space<vmem>>, %arg2: memref<128x132xf32, #tpu.memory_space<vmem>>, %arg3: memref<32x128xbf16, #tpu.memory_space<vmem>>, %arg4: memref<32x4xf32, #tpu.memory_space<vmem>>) attributes {dimension_semantics = [#tpu.dimension_semantics<parallel>], iteration_bounds = array<i64: 4>, scalar_prefetch = 0 : i64, scratch_operands = 0 : i64, tpu.core_type = #tpu.core_type<tc>, window_params = [{transform_indices = @transform_0, window_bounds = array<i64: 32, 128>}, {pipeline_mode = #tpu.pipeline_mode<synchronous>, transform_indices = @transform_1, window_bounds = array<i64: 128, 132>}, {transform_indices = @transform_2, window_bounds = array<i64: 32, 128>}, {transform_indices = @transform_3, window_bounds = array<i64: 32, 4>}]} {
    %c0 = arith.constant 0 : index
    %c0_0 = arith.constant 0 : index
    %0 = vector.load %arg1[%c0, %c0_0] : memref<32x128xf32, #tpu.memory_space<vmem>>, vector<32x128xf32>
    %1 = arith.truncf %0 : vector<32x128xf32> to vector<32x128xbf16>
    %c0_1 = arith.constant 0 : index
    %c0_2 = arith.constant 0 : index
    %2 = vector.load %arg2[%c0_1, %c0_2] : memref<128x132xf32, #tpu.memory_space<vmem>>, vector<128x132xf32>
    %3 = arith.truncf %2 : vector<128x132xf32> to vector<128x132xbf16>
    %cst = arith.constant dense<0.000000e+00> : vector<32x132xf32>
    %4 = tpu.matmul %1, %3, %cst {dimension_numbers = #tpu.dot_dimension_numbers<[1], [0], [0], [1], [0, 0, 1, 1], [], []>} : vector<32x128xbf16>, vector<128x132xbf16>, vector<32x132xf32> -> vector<32x132xf32>
    %5 = vector.extract_strided_slice %4 {offsets = [0, 0], sizes = [32, 128], strides = [1, 1]} : vector<32x132xf32> to vector<32x128xf32>
    %6 = arith.truncf %5 : vector<32x128xf32> to vector<32x128xbf16>
    %c0_3 = arith.constant 0 : index
    %c0_4 = arith.constant 0 : index
    %7 = vector.load %arg3[%c0_3, %c0_4] : memref<32x128xbf16, #tpu.memory_space<vmem>>, vector<32x128xbf16>
    tpu.vector_store %arg3[%c0_3, %c0_4], %6 {strides = array<i32>} : memref<32x128xbf16, #tpu.memory_space<vmem>>, vector<32x128xbf16>,
    %8 = vector.extract_strided_slice %4 {offsets = [0, 128], sizes = [32, 4], strides = [1, 1]} : vector<32x132xf32> to vector<32x4xf32>
    %c0_5 = arith.constant 0 : index
    %c0_6 = arith.constant 0 : index
    %9 = vector.load %arg4[%c0_5, %c0_6] : memref<32x4xf32, #tpu.memory_space<vmem>>, vector<32x4xf32>
    tpu.vector_store %arg4[%c0_5, %c0_6], %8 {strides = array<i32>} : memref<32x4xf32, #tpu.memory_space<vmem>>, vector<32x4xf32>,
    return
  }
  func.func @transform_0(%arg0: i32) -> (i32, i32) {
    %c0_i32 = arith.constant 0 : i32
    %c0_i32_0 = arith.constant 0 : i32
    return %arg0, %c0_i32 : i32, i32
  }
  func.func @transform_1(%arg0: i32) -> (i32, i32) {
    %c0_i32 = arith.constant 0 : i32
    %c0_i32_0 = arith.constant 0 : i32
    %c0_i32_1 = arith.constant 0 : i32
    return %c0_i32, %c0_i32_0 : i32, i32
  }
  func.func @transform_2(%arg0: i32) -> (i32, i32) {
    %c0_i32 = arith.constant 0 : i32
    %c0_i32_0 = arith.constant 0 : i32
    return %arg0, %c0_i32 : i32, i32
  }
  func.func @transform_3(%arg0: i32) -> (i32, i32) {
    %c0_i32 = arith.constant 0 : i32
    %c0_i32_0 = arith.constant 0 : i32
    return %arg0, %c0_i32 : i32, i32
  }
}

</mosaic_0001>

<bundles_post_ra>
// kernel: tpu_custom_call.1
= control target key start
LH: loop header
LB: loop body
LE: loop exit
PB: predicated region body
PF: predicated region fallthrough
CT: control target
= control target key end

     0   :  { %9 = vsyncpa [#allocation3], 0  ;;  %s821_s0 = inlined_call_operand.vmem [shape: f32[128,128], index: 0, kind: input, shape index: {}]   ;;  %s822_s1 = inlined_call_operand.vmem [shape: f32[128,132], index: 1, kind: input, shape index: {}]   ;;  %s823_s2 = inlined_call_operand.hbm [shape: bf16[128,128], index: 2, kind: output, shape index: {0}]   ;;  %s824_s3 = inlined_call_operand.vmem [shape: f32[128,4], index: 3, kind: output, shape index: {1}]  }
   0x1   :  { %11 = vsyncpa [#allocation3 + $0x1], 0  ;;  %s609_s12 = smov 0   ;;  %s611_s13 = smov 0  }
   0x2   :  { %s613_s14 = smov 0   ;;  %s615_s15 = smov 0  }
   0x3 LB: > { %s630_s16 = sadd.s32 4294967295, %s583_s15   ;;  %s429_s17 = sadd.s32 4294967294, %s583_s15   ;;  %s583_s15 = sphi %s615_s15, %s830_s15   ;;  %s579_s14 = sphi %s613_s14, %s829_s14   ;;  %s575_s13 = sphi %s611_s13, %s828_s13   ;;  %s571_s12 = sphi %s609_s12, %s827_s12  }
   0x4   : > { %s634_s18 = sadd.s32 1, %s583_s15   ;;  %s71_s19 = sadd.s32 1, %s579_s14 }
   0x5   : > { %s68_s20 = ssub.s32 %s583_s15, %s634_s18  ;;  %p81_p0 = scmp.ne.s32.totalorder %s579_s14, %s575_s13 }
   0x6   : > { %p69_p1 = scmp.eq.s32.totalorder %s68_s20, 0  ;;  %p82_p2 = scmp.eq.s32.totalorder %s630_s16, 3 }
   0x7   : > { %p87_p3 = scmp.ne.s32.totalorder %s575_s13, %s571_s12  ;;  %p88_p4 = scmp.eq.s32.totalorder %s429_s17, 3 }
   0x8   : > { %s645_s21 = scalar_select %p69_p1, %s579_s14, %s71_s19  }
   0x9   : > { %p647_p5 = por %p82_p2, %p81_p0  ;;  %p651_p6 = por %p88_p4, %p87_p3 }
   0xa   : > { %p432_p7 = scmp.ge.s32.totalorder %s583_s15, 1  ;;  %p144_p8 = scmp.lt.s32.totalorder %s583_s15, 5 }
   0xc   : > { %p145_p9 = pnand %p432_p7, %p144_p8 }
   0xd   : > { %v194_v0 = vld [vmem:[%s822_s1 + $0x8] sm:$0xff] (!%p145_p9)  ;;  %v196_v1 = vld [vmem:[%s822_s1 + $0x18] sm:$0xff] (!%p145_p9)  ;;  %v193_v2 = vld [vmem:[%s822_s1] sm:$0xff] (!%p145_p9)  ;;  %v585_v7 = vmov (!%p145_p9), 0   ;;  %s434_s24 = sshll.u32 (!%p145_p9), %s630_s16, 2  ;;  %s163_s19 = sand.u32 (!%p145_p9), 1, %s575_s13  }
   0xe   : > { %148 = sbr.rel (%p145_p9) target bundleno = 279 (0x117), region = 28  ;;  %v226_v3 = vpack.c.bf16 (!%p145_p9), %v196_v1, %v194_v0  ;;  %v195_v4 = vld [vmem:[%s822_s1 + $0x10] sm:$0xff] (!%p145_p9)  ;;  %v198_v5 = vld [vmem:[%s822_s1 + $0x28] sm:$0xff] (!%p145_p9)  ;;  %v200_v6 = vld [vmem:[%s822_s1 + $0x38] sm:$0xff] (!%p145_p9)  ;;  %273 = vmatprep.mubr.bf16.mxu0 (!%p145_p9), %v585_v7  ;;  %283 = vmatprep.mubr.bf16.mxu1 (!%p145_p9), %v585_v7  ;;  %p174_p10 = scmp.lt.s32.totalorder (!%p145_p9), %s434_s24, 15  ;;  %vm314_vm0 = vcmask (!%p145_p9), 31744  }
   0xf   : > { %v225_v8 = vpack.c.bf16 (!%p145_p9), %v195_v4, %v193_v2  ;;  %v228_v9 = vpack.c.bf16 (!%p145_p9), %v200_v6, %v198_v5  ;;  %v197_v10 = vld [vmem:[%s822_s1 + $0x20] sm:$0xff] (!%p145_p9)  ;;  %v199_v11 = vld [vmem:[%s822_s1 + $0x30] sm:$0xff] (!%p145_p9)  ;;  %v202_v12 = vld [vmem:[%s822_s1 + $0x48] sm:$0xff] (!%p145_p9)  ;;  %s433_s20 = sshll.u32 (!%p145_p9), %s163_s19, 4  ;;  %s451_s4 = sshll.u32 (!%p145_p9), %s630_s16, 8 }
  0x10   : > { %241 = vmatprep.subr.bf16.mxu0 (!%p145_p9), %v226_v3  ;;  %463 = vmatprep.subr.bf16.mxu1 (!%p145_p9), %v226_v3  ;;  %v204_v13 = vld [vmem:[%s822_s1 + $0x58] sm:$0xff] (!%p145_p9)  ;;  %v227_v14 = vpack.c.bf16 (!%p145_p9), %v199_v11, %v197_v10  ;;  %v201_v16 = vld [vmem:[%s822_s1 + $0x40] sm:$0xff] (!%p145_p9)  ;;  %v203_v17 = vld [vmem:[%s822_s1 + $0x50] sm:$0xff] (!%p145_p9)  ;;  %s165_s29 = scalar_lea.vmem (!%p145_p9), [#allocation2], %s433_s20  ;;  %s776_s5 = scalar_lea.hbm (!%p145_p9), %s823_s2, %s451_s4 }
  0x11   : > { %242 = vmatpush1.bf16.msra.mxu0 (!%p145_p9), %v225_v8  ;;  %471 = vmatpush1.bf16.msra.mxu1 (!%p145_p9), %v225_v8  ;;  %v230_v15 = vpack.c.bf16 (!%p145_p9), %v204_v13, %v202_v12  ;;  %v206_v18 = vld [vmem:[%s822_s1 + $0x68] sm:$0xff] (!%p145_p9)  ;;  %v208_v19 = vld [vmem:[%s822_s1 + $0x78] sm:$0xff] (!%p145_p9)  ;;  %v229_v20 = vpack.c.bf16 (!%p145_p9), %v203_v17, %v201_v16  ;;  %v205_v22 = vld [vmem:[%s822_s1 + $0x60] sm:$0xff] (!%p145_p9)  ;;  %s338_s30 = sshll.u32 (!%p145_p9), %s165_s29, 4  ;;  %s780_s16 = scalar_lea.sflag (!%p145_p9), [#allocation3], %s163_s19  ;;  %s771_s30 = int_to_ptr.vmem [resolvable:$true] %s338_s30 }
  0x12   : > { %243 = vmatprep.subr.bf16.mxu0 (!%p145_p9), %v228_v9  ;;  %464 = vmatprep.subr.bf16.mxu1 (!%p145_p9), %v228_v9  ;;  %v232_v21 = vpack.c.bf16 (!%p145_p9), %v208_v19, %v206_v18  ;;  %v207_v23 = vld [vmem:[%s822_s1 + $0x70] sm:$0xff] (!%p145_p9)  ;;  %v210_v24 = vld [vmem:[%s822_s1 + $0x88] sm:$0xff] (!%p145_p9)  ;;  %v212_v25 = vld [vmem:[%s822_s1 + $0x98] sm:$0xff] (!%p145_p9)  ;;  %s521_s6 = scalar_lea.vmem (!%p145_p9), %s771_s30, 256  ;;  %s586_s7 = smov (!%p145_p9), [#allocation2]  }
  0x13   : > { %v231_v26 = vpack.c.bf16 (!%p145_p9), %v207_v23, %v205_v22  ;;  %v234_v27 = vpack.c.bf16 (!%p145_p9), %v212_v25, %v210_v24  ;;  %v209_v28 = vld [vmem:[%s822_s1 + $0x80] sm:$0xff] (!%p145_p9)  ;;  %v211_v29 = vld [vmem:[%s822_s1 + $0x90] sm:$0xff] (!%p145_p9)  ;;  %v214_v30 = vld [vmem:[%s822_s1 + $0xa8] sm:$0xff] (!%p145_p9)  ;;  %p522_p11 = scmp.ne.s32.totalorder (!%p145_p9), %s771_s30, %s521_s6 }
  0x14   : > { %v216_v31 = vld [vmem:[%s822_s1 + $0xb8] sm:$0xff] (!%p145_p9)  ;;  %v233_v32 = vpack.c.bf16 (!%p145_p9), %v211_v29, %v209_v28  ;;  %v213_v34 = vld [vmem:[%s822_s1 + $0xa0] sm:$0xff] (!%p145_p9)  ;;  %v215_v35 = vld [vmem:[%s822_s1 + $0xb0] sm:$0xff] (!%p145_p9) }
  0x15   : > { %244 = vmatpush1.bf16.msra.mxu0 %v227_v14  ;;  %472 = vmatpush1.bf16.msra.mxu1 %v227_v14  ;;  %v236_v33 = vpack.c.bf16 %v216_v31, %v214_v30  ;;  %s832_s24 = smov (!%p174_p10, %s434_s24), 15  ;;  %v218_v36 = vld [vmem:[%s822_s1 + $0xc8] sm:$0xff]  ;;  %v220_v37 = vld [vmem:[%s822_s1 + $0xd8] sm:$0xff]  ;;  %v235_v38 = vpack.c.bf16 %v215_v35, %v213_v34  ;;  %v217_v40 = vld [vmem:[%s822_s1 + $0xc0] sm:$0xff]  ;;  %p523_p12 = pnand %p522_p11, %p647_p5 }
  0x16   : > { %245 = vmatprep.subr.bf16.mxu0 %v230_v15  ;;  %465 = vmatprep.subr.bf16.mxu1 %v230_v15  ;;  %v238_v39 = vpack.c.bf16 %v220_v37, %v218_v36  ;;  %v219_v41 = vld [vmem:[%s822_s1 + $0xd0] sm:$0xff]  ;;  %s435_s28 = sshll.u32 %s832_s24, 3  ;;  %v222_v42 = vld [vmem:[%s822_s1 + $0xe8] sm:$0xff]  ;;  %v224_v43 = vld [vmem:[%s822_s1 + $0xf8] sm:$0xff] }
  0x17   : > { %v237_v44 = vpack.c.bf16 %v219_v41, %v217_v40  ;;  %s177_s8 = scalar_lea.vmem %s821_s0, %s435_s28  ;;  %v240_v45 = vpack.c.bf16 %v224_v43, %v222_v42  ;;  %v221_v46 = vld [vmem:[%s822_s1 + $0xe0] sm:$0xff]  ;;  %v223_v47 = vld [vmem:[%s822_s1 + $0xf0] sm:$0xff]  ;;  %s184_s27 = scalar_lea.vmem %s824_s3, %s435_s28 }
  0x18   : > { %v187_v48 = vld [vmem:[%s177_s8] sm:$0xff]  ;;  %v239_v49 = vpack.c.bf16 %v223_v47, %v221_v46  ;;  %v188_v50 = vld [vmem:[%s177_s8 + $0x8] sm:$0xff]  ;;  %v189_v51 = vld [vmem:[%s177_s8 + $0x10] sm:$0xff]  ;;  %p524_p13 = pneg %p523_p12 }
  0x19   : > { %246 = vmatpush1.bf16.msra.mxu0 %v229_v20  ;;  %473 = vmatpush1.bf16.msra.mxu1 %v229_v20  ;;  %v190_v52 = vld [vmem:[%s177_s8 + $0x18] sm:$0xff]  ;;  %v191_v53 = vpack.c.bf16 %v188_v50, %v187_v48  ;;  %s525_s8 = sshll.u32 %s586_s7, 4  ;;  %s526_s8 = int_to_ptr.vmem [resolvable:$false] %s525_s8 }
  0x1a   : > { %247 = vmatprep.subr.bf16.mxu0 %v232_v21  ;;  %466 = vmatprep.subr.bf16.mxu1 %v232_v21  ;;  %v192_v54 = vpack.c.bf16 %v190_v52, %v189_v51  ;;  %s527_s9 = scalar_lea.vmem %s526_s8, 512  ;;  %p528_p0 = scmp.lt.s32.totalorder %s771_s30, %s526_s8 }
  0x1b   : > { %p529_p1 = scmp.lt.s32.totalorder %s527_s9, %s521_s6 }
  0x1d   : > { %248 = vmatpush1.bf16.msra.mxu0 %v231_v26  ;;  %474 = vmatpush1.bf16.msra.mxu1 %v231_v26  ;;  %p530_p2 = por %p529_p1, %p528_p0 }
  0x1e   : > { %249 = vmatprep.subr.bf16.mxu0 %v234_v27  ;;  %467 = vmatprep.subr.bf16.mxu1 %v234_v27 }
  0x1f   : > { %p531_p3 = pnand %p530_p2, %p524_p13 }
  0x21   : > { %250 = vmatpush1.bf16.msra.mxu0 %v233_v32  ;;  %475 = vmatpush1.bf16.msra.mxu1 %v233_v32 }
  0x22   : > { %251 = vmatprep.subr.bf16.mxu0 %v236_v33  ;;  %468 = vmatprep.subr.bf16.mxu1 %v236_v33 }
  0x25   : > { %252 = vmatpush1.bf16.msra.mxu0 %v235_v38  ;;  %476 = vmatpush1.bf16.msra.mxu1 %v235_v38 }
  0x26   : > { %253 = vmatprep.subr.bf16.mxu0 %v238_v39  ;;  %469 = vmatprep.subr.bf16.mxu1 %v238_v39 }
  0x29   : > { %254 = vmatpush1.bf16.msra.mxu0 %v237_v44  ;;  %477 = vmatpush1.bf16.msra.mxu1 %v237_v44 }
  0x2a   : > { %255 = vmatprep.subr.bf16.mxu0 %v240_v45  ;;  %470 = vmatprep.subr.bf16.mxu1 %v240_v45 }
  0x2d   : > { %256 = vmatpush1.bf16.msra.mxu0 %v239_v49  ;;  %478 = vmatpush1.bf16.msra.mxu1 %v239_v49 }
  0x30   : > { %274 = vmatmul.mubr.bf16.vlgmr.msra.gmra.mrb[0].mxu0 %v191_v53  ;;  %284 = vmatmul.mubr.bf16.vlgmr.msra.gmra.mrb[0].mxu1 %v192_v54 }
 0x103   : > { %v275_v55 = vpop.f32.mrb[0].mxu0  ;;  %v285_v56 = vpop.f32.mrb[0].mxu1 }
 0x104   : > { %v277_v57 = vpop.f32.mrb[1].mxu0  ;;  %v287_v58 = vpop.f32.mrb[1].mxu1 }
 0x105   : > { %315 = vst.msk [vmem:[%s184_s27] sm:$0xff] %vm314_vm0, %v277_v57  ;;  %317 = vst.msk [vmem:[%s184_s27 + $0x10] sm:$0xff] %vm314_vm0, %v287_v58  ;;  %v279_v59 = vpop.f32.mrb[2].mxu0  ;;  %v289_v60 = vpop.f32.mrb[2].mxu1 }
 0x106   : > { %v455_v61 = vpack.c.bf16 %v279_v59, %v275_v55  ;;  %v460_v62 = vpack.c.bf16 %v289_v60, %v285_v56  ;;  %v281_v63 = vpop.f32.mrb[3].mxu0  ;;  %v291_v0 = vpop.f32.mrb[3].mxu1 }
 0x107   : > { %316 = vst.msk [vmem:[%s184_s27 + $0x8] sm:$0xff] %vm314_vm0, %v281_v63  ;;  %318 = vst.msk [vmem:[%s184_s27 + $0x18] sm:$0xff] %vm314_vm0, %v291_v0 }
 0x108   : > { %456 = vst [vmem:[%s165_s29] sm:$0xff] %v455_v61   ;;  %462 = vst [vmem:[%s165_s29 + $0x8] sm:$0xff] %v460_v62  }
 0x109   : > { %534 = shalt.err (!%p531_p3)
}
 0x10a   : > { %s535_s10 = scalar_lea.hbm %s776_s5, 256  ;;  %s539_s19 = scalar_lea.hbm %s823_s2, 1024 }
 0x10b   : > { %p536_p4 = scmp.ne.s32.totalorder %s776_s5, %s535_s10  ;;  %p540_p9 = scmp.lt.u32.totalorder %s776_s5, %s823_s2 }
 0x10c   : > { %p541_p10 = scmp.lt.u32.totalorder %s539_s19, %s535_s10  ;;  %p543_p12 = scmp.lt.u32.totalorder %s535_s10, %s776_s5 }
 0x10d   : > { %p537_p7 = pnand %p536_p4, %p647_p5 }
 0x10e   : > { %p542_p11 = por %p541_p10, %p540_p9 }
 0x10f   : > { %p538_p8 = pneg %p537_p7 }
 0x110   : > { %p544_p13 = por %p543_p12, %p542_p11 }
 0x112   : > { %p545_p0 = pnand %p544_p13, %p538_p8 }
 0x114   : > { %548 = shalt.err (!%p545_p0)
}
 0x115   : > { %s587_s26 = smov 64   ;;  %s588_s27 = smov 4  }
 0x116   : > { %479 = dma.vmem_to_hbm [thread:$0]  (%p647_p5), %s771_s30, 256, %s776_s5, %s780_s16, %s587_s26, %s587_s26, %s588_s27  }
 0x117 PF: > { %p485_p1 = scmp.ge.s32.totalorder %s583_s15, 2  ;;  %s357_s29 = sand.u32 1, %s571_s12  }
 0x118   : > { %s358_s4 = scalar_lea.sflag [#allocation3], %s357_s29 }
 0x119   : > { %p482_p2 = pnand %p485_p1, %p651_p6 }
 0x11b   : > { %566 = dma.done.wait (!%p482_p2), %s358_s4, 256  }
 0x11c   : > { %568 = vsyncadd (!%p482_p2), %s358_s4, 4294967040  ;;  %p14_p3 = scmp.ge.s32.totalorder %s634_s18, 6   ;;  %s827_s12 = smov %s575_s13 }
 0x11d   : > { %s828_s13 = smov %s579_s14  ;;  %s829_s14 = smov %s645_s21 }
 0x11e   : > { %s830_s15 = smov %s634_s18  ;;  %16 = sbr.rel (!%p14_p3) target bundleno = 3 (0x3), region = 75 }
 0x125   :  { %371 = vsyncpa [#allocation3], 1 }
 0x126   :  { %373 = vsyncpa [#allocation3 + $0x1], 1 }

</bundles_post_ra>
